<compile_context>
chip_gen: v5e
topology: v5e:2x2
jax: 0.10.0
libtpu: 0.0.40
codegen_flags: <defaults>
</compile_context>

<pallas_src>
import functools

import jax
import jax.numpy as jnp
from jax.experimental import pallas as pl
from jax.experimental.pallas import tpu as pltpu


def _attention_kernel(x_ref, wqkv_ref, bqkv_ref, wo_ref, bo_ref, o_ref,
                      *, heads, dim, scale):
    """One batch element per grid step: fused QKV -> MHA -> output projection."""
    dh = dim // heads

    # (n, dim) token rows of this batch element; bf16 feed for the MXU.
    x = x_ref[0].astype(jnp.bfloat16)

    # Single QKV projection for the whole sequence (one MXU matmul, N = 3*dim).
    qkv = jnp.dot(x, wqkv_ref[...], preferred_element_type=jnp.float32) + bqkv_ref[...]

    # Fold dim**-0.5 into q once (n*dim muls instead of heads*n*n).
    q2d = qkv[:, 0 * dim:1 * dim] * scale
    k2d = qkv[:, 1 * dim:2 * dim]
    v2d = qkv[:, 2 * dim:3 * dim]

    # Head-major (heads, n, dh) layout so the attention matmuls are head-batched
    # dot_generals (no per-head Python matmul loop, no value accumulator).
    def split_heads(t):
        return jnp.stack([t[:, h * dh:(h + 1) * dh] for h in range(heads)], axis=0)

    q = split_heads(q2d).astype(jnp.bfloat16)
    k = split_heads(k2d).astype(jnp.bfloat16)
    v = split_heads(v2d).astype(jnp.bfloat16)

    # Scores: (heads, n, n).  Contracting-dim einsum -> no explicit k transpose.
    dots = jnp.einsum('hid,hjd->hij', q, k, preferred_element_type=jnp.float32)

    # Numerically-stable softmax; all statistics kept in f32.
    m = jnp.max(dots, axis=-1, keepdims=True)
    p = jnp.exp(dots - m)
    denom = jnp.sum(p, axis=-1, keepdims=True)
    attn = p * pl.reciprocal(denom, approx=True)     # EUP reciprocal, not VPU divide

    # (heads, n, dh) attention output, f32 accumulation.
    out = jnp.einsum('hij,hjd->hid', attn.astype(jnp.bfloat16), v,
                     preferred_element_type=jnp.float32)

    # Merge heads into a lane-contiguous (n, dim) slab (cheap lane concat at
    # dim<=128), then ONE K=dim output-projection matmul.
    merged = jnp.concatenate([out[h] for h in range(heads)], axis=-1)
    y = jnp.dot(merged.astype(jnp.bfloat16), wo_ref[...],
                preferred_element_type=jnp.float32) + bo_ref[...]

    # TODO(synk): Dropout(p=0.1) is identity in eval mode; no RNG applied here.
    o_ref[0] = y.astype(o_ref.dtype)


def attention_forward(x, wqkv, bqkv, wo, bo, *, heads):
    b, n, dim = x.shape
    scale = float(dim) ** (-0.5)

    # MXU inputs in bf16 (f32 accumulation inside the kernel); biases stay f32.
    wqkv_bf = wqkv.astype(jnp.bfloat16)
    wo_bf = wo.astype(jnp.bfloat16)

    kernel = functools.partial(_attention_kernel, heads=heads, dim=dim, scale=scale)

    return pl.pallas_call(
        kernel,
        out_shape=jax.ShapeDtypeStruct((b, n, dim), x.dtype),
        grid=(b,),
        in_specs=[
            # One batch element per grid step.
            pl.BlockSpec((1, n, dim), lambda i: (i, 0, 0)),
            # Weights / biases: constant index_maps -> DMA'd once, VMEM-resident.
            pl.BlockSpec((dim, 3 * dim), lambda i: (0, 0)),
            pl.BlockSpec((1, 3 * dim), lambda i: (0, 0)),
            pl.BlockSpec((dim, dim), lambda i: (0, 0)),
            pl.BlockSpec((1, dim), lambda i: (0, 0)),
        ],
        # TODO(synk): pad dim to a multiple of 128 for lane-dense stores if the
        # real model keeps dim < 128 (here dim=32 -> masked partial stores).
        out_specs=pl.BlockSpec((1, n, dim), lambda i: (i, 0, 0)),
        compiler_params=pltpu.CompilerParams(
            dimension_semantics=("parallel",),          # v7x: both TCs get batches
            vmem_limit_bytes=32 * 1024 * 1024,          # explicit scoped-VMEM budget
        ),
    )(x, wqkv_bf, bqkv, wo_bf, bo)


def attention_reference(x, wqkv, bqkv, wo, bo, *, heads):
    """Pure-JAX f32 reference matching the PyTorch forward (mask=None, eval)."""
    b, n, dim = x.shape
    d = dim // heads
    scale = float(dim) ** (-0.5)
    qkv = jnp.einsum('bnc,cf->bnf', x, wqkv) + bqkv[0]
    q, k, v = jnp.split(qkv, 3, axis=-1)

    def to_heads(t):
        return t.reshape(b, n, heads, d).transpose(0, 2, 1, 3)  # b h n d

    q, k, v = map(to_heads, (q, k, v))
    dots = jnp.einsum('bhid,bhjd->bhij', q, k) * scale
    attn = jax.nn.softmax(dots, axis=-1)
    out = jnp.einsum('bhij,bhjd->bhid', attn, v)
    out = out.transpose(0, 2, 1, 3).reshape(b, n, dim)
    return jnp.einsum('bnc,cf->bnf', out, wo) + bo[0]


if __name__ == "__main__":
    # Small shapes implied by the module: batch=2, seq=8, dim=32, heads=8 (dh=4)
    B, N, DIM, HEADS = 2, 8, 32, 8

    key = jax.random.PRNGKey(0)
    kx, kw1, kb1, kw2, kb2 = jax.random.split(key, 5)

    x = jax.random.normal(kx, (B, N, DIM), dtype=jnp.float32)

    # Deterministic synthetic parameters (shapes from nn.Linear in __init__).
    # nn.Linear(dim, 3*dim): weight (3*dim, dim) -> stored transposed as (dim, 3*dim)
    wqkv = jax.random.normal(kw1, (DIM, 3 * DIM), dtype=jnp.float32) * (DIM ** -0.5)
    bqkv = jax.random.normal(kb1, (1, 3 * DIM), dtype=jnp.float32) * 0.02
    wo = jax.random.normal(kw2, (DIM, DIM), dtype=jnp.float32) * (DIM ** -0.5)
    bo = jax.random.normal(kb2, (1, DIM), dtype=jnp.float32) * 0.02

    y = attention_forward(x, wqkv, bqkv, wo, bo, heads=HEADS)
    y = jax.block_until_ready(y)

    y_ref = attention_reference(x, wqkv, bqkv, wo, bo, heads=HEADS)
    assert y.shape == (B, N, DIM)
    # Tolerance covers bf16 MXU inputs (f32 accumulation) and the approximate
    # EUP reciprocal in the softmax normalization; softmax statistics are f32.
    assert jnp.allclose(y, y_ref, atol=5e-2, rtol=5e-2), "mismatch vs reference"

    print("KERNEL_OK")
</pallas_src>

<mosaic_0001>
module attributes {stable_mosaic.version = 11 : i64} {
  func.func @_attention_kernel(%arg0: i32, %arg1: memref<1x8x32xf32, #tpu.memory_space<vmem>>, %arg2: memref<32x96xbf16, #tpu.memory_space<vmem>>, %arg3: memref<1x96xf32, #tpu.memory_space<vmem>>, %arg4: memref<32x32xbf16, #tpu.memory_space<vmem>>, %arg5: memref<1x32xf32, #tpu.memory_space<vmem>>, %arg6: memref<1x8x32xf32, #tpu.memory_space<vmem>>) attributes {dimension_semantics = [#tpu.dimension_semantics<parallel>], iteration_bounds = array<i64: 2>, scalar_prefetch = 0 : i64, scratch_operands = 0 : i64, tpu.core_type = #tpu.core_type<tc>, window_params = [{transform_indices = @transform_0, window_bounds = array<i64: 1, 8, 32>}, {pipeline_mode = #tpu.pipeline_mode<synchronous>, transform_indices = @transform_1, window_bounds = array<i64: 32, 96>}, {pipeline_mode = #tpu.pipeline_mode<synchronous>, transform_indices = @transform_2, window_bounds = array<i64: 1, 96>}, {pipeline_mode = #tpu.pipeline_mode<synchronous>, transform_indices = @transform_3, window_bounds = array<i64: 32, 32>}, {pipeline_mode = #tpu.pipeline_mode<synchronous>, transform_indices = @transform_4, window_bounds = array<i64: 1, 32>}, {transform_indices = @transform_5, window_bounds = array<i64: 1, 8, 32>}]} {
    %c0 = arith.constant 0 : index
    %c0_0 = arith.constant 0 : index
    %c0_1 = arith.constant 0 : index
    %0 = vector.load %arg1[%c0, %c0_0, %c0_1] : memref<1x8x32xf32, #tpu.memory_space<vmem>>, vector<1x8x32xf32>
    %1 = vector.shape_cast %0 : vector<1x8x32xf32> to vector<8x32xf32>
    %2 = arith.truncf %1 : vector<8x32xf32> to vector<8x32xbf16>
    %c0_2 = arith.constant 0 : index
    %c0_3 = arith.constant 0 : index
    %3 = vector.load %arg2[%c0_2, %c0_3] : memref<32x96xbf16, #tpu.memory_space<vmem>>, vector<32x96xbf16>
    %cst = arith.constant dense<0.000000e+00> : vector<8x96xf32>
    %4 = tpu.matmul %2, %3, %cst {dimension_numbers = #tpu.dot_dimension_numbers<[1], [0], [0], [1], [0, 0, 1, 1], [], []>} : vector<8x32xbf16>, vector<32x96xbf16>, vector<8x96xf32> -> vector<8x96xf32>
    %c0_4 = arith.constant 0 : index
    %c0_5 = arith.constant 0 : index
    %5 = vector.load %arg3[%c0_4, %c0_5] : memref<1x96xf32, #tpu.memory_space<vmem>>, vector<1x96xf32>
    %6 = vector.broadcast %5 : vector<1x96xf32> to vector<8x96xf32>
    %7 = arith.addf %4, %6 : vector<8x96xf32>
    %8 = vector.extract_strided_slice %7 {offsets = [0, 0], sizes = [8, 32], strides = [1, 1]} : vector<8x96xf32> to vector<8x32xf32>
    %cst_6 = arith.constant 0.176776692 : f32
    %9 = vector.broadcast %cst_6 : f32 to vector<8x32xf32>
    %10 = arith.mulf %8, %9 : vector<8x32xf32>
    %11 = vector.extract_strided_slice %7 {offsets = [0, 32], sizes = [8, 32], strides = [1, 1]} : vector<8x96xf32> to vector<8x32xf32>
    %12 = vector.extract_strided_slice %7 {offsets = [0, 64], sizes = [8, 32], strides = [1, 1]} : vector<8x96xf32> to vector<8x32xf32>
    %13 = vector.extract_strided_slice %10 {offsets = [0, 0], sizes = [8, 4], strides = [1, 1]} : vector<8x32xf32> to vector<8x4xf32>
    %14 = vector.extract_strided_slice %10 {offsets = [0, 4], sizes = [8, 4], strides = [1, 1]} : vector<8x32xf32> to vector<8x4xf32>
    %15 = vector.extract_strided_slice %10 {offsets = [0, 8], sizes = [8, 4], strides = [1, 1]} : vector<8x32xf32> to vector<8x4xf32>
    %16 = vector.extract_strided_slice %10 {offsets = [0, 12], sizes = [8, 4], strides = [1, 1]} : vector<8x32xf32> to vector<8x4xf32>
    %17 = vector.extract_strided_slice %10 {offsets = [0, 16], sizes = [8, 4], strides = [1, 1]} : vector<8x32xf32> to vector<8x4xf32>
    %18 = vector.extract_strided_slice %10 {offsets = [0, 20], sizes = [8, 4], strides = [1, 1]} : vector<8x32xf32> to vector<8x4xf32>
    %19 = vector.extract_strided_slice %10 {offsets = [0, 24], sizes = [8, 4], strides = [1, 1]} : vector<8x32xf32> to vector<8x4xf32>
    %20 = vector.extract_strided_slice %10 {offsets = [0, 28], sizes = [8, 4], strides = [1, 1]} : vector<8x32xf32> to vector<8x4xf32>
    %21 = vector.shape_cast %13 : vector<8x4xf32> to vector<1x8x4xf32>
    %22 = vector.shape_cast %14 : vector<8x4xf32> to vector<1x8x4xf32>
    %23 = vector.shape_cast %15 : vector<8x4xf32> to vector<1x8x4xf32>
    %24 = vector.shape_cast %16 : vector<8x4xf32> to vector<1x8x4xf32>
    %25 = vector.shape_cast %17 : vector<8x4xf32> to vector<1x8x4xf32>
    %26 = vector.shape_cast %18 : vector<8x4xf32> to vector<1x8x4xf32>
    %27 = vector.shape_cast %19 : vector<8x4xf32> to vector<1x8x4xf32>
    %28 = vector.shape_cast %20 : vector<8x4xf32> to vector<1x8x4xf32>
    %29 = tpu.concatenate %21, %22, %23, %24, %25, %26, %27, %28 in 0 : vector<1x8x4xf32>, vector<1x8x4xf32>, vector<1x8x4xf32>, vector<1x8x4xf32>, vector<1x8x4xf32>, vector<1x8x4xf32>, vector<1x8x4xf32>, vector<1x8x4xf32> -> vector<8x8x4xf32>
    %30 = arith.truncf %29 : vector<8x8x4xf32> to vector<8x8x4xbf16>
    %31 = vector.extract_strided_slice %11 {offsets = [0, 0], sizes = [8, 4], strides = [1, 1]} : vector<8x32xf32> to vector<8x4xf32>
    %32 = vector.extract_strided_slice %11 {offsets = [0, 4], sizes = [8, 4], strides = [1, 1]} : vector<8x32xf32> to vector<8x4xf32>
    %33 = vector.extract_strided_slice %11 {offsets = [0, 8], sizes = [8, 4], strides = [1, 1]} : vector<8x32xf32> to vector<8x4xf32>
    %34 = vector.extract_strided_slice %11 {offsets = [0, 12], sizes = [8, 4], strides = [1, 1]} : vector<8x32xf32> to vector<8x4xf32>
    %35 = vector.extract_strided_slice %11 {offsets = [0, 16], sizes = [8, 4], strides = [1, 1]} : vector<8x32xf32> to vector<8x4xf32>
    %36 = vector.extract_strided_slice %11 {offsets = [0, 20], sizes = [8, 4], strides = [1, 1]} : vector<8x32xf32> to vector<8x4xf32>
    %37 = vector.extract_strided_slice %11 {offsets = [0, 24], sizes = [8, 4], strides = [1, 1]} : vector<8x32xf32> to vector<8x4xf32>
    %38 = vector.extract_strided_slice %11 {offsets = [0, 28], sizes = [8, 4], strides = [1, 1]} : vector<8x32xf32> to vector<8x4xf32>
    %39 = vector.shape_cast %31 : vector<8x4xf32> to vector<1x8x4xf32>
    %40 = vector.shape_cast %32 : vector<8x4xf32> to vector<1x8x4xf32>
    %41 = vector.shape_cast %33 : vector<8x4xf32> to vector<1x8x4xf32>
    %42 = vector.shape_cast %34 : vector<8x4xf32> to vector<1x8x4xf32>
    %43 = vector.shape_cast %35 : vector<8x4xf32> to vector<1x8x4xf32>
    %44 = vector.shape_cast %36 : vector<8x4xf32> to vector<1x8x4xf32>
    %45 = vector.shape_cast %37 : vector<8x4xf32> to vector<1x8x4xf32>
    %46 = vector.shape_cast %38 : vector<8x4xf32> to vector<1x8x4xf32>
    %47 = tpu.concatenate %39, %40, %41, %42, %43, %44, %45, %46 in 0 : vector<1x8x4xf32>, vector<1x8x4xf32>, vector<1x8x4xf32>, vector<1x8x4xf32>, vector<1x8x4xf32>, vector<1x8x4xf32>, vector<1x8x4xf32>, vector<1x8x4xf32> -> vector<8x8x4xf32>
    %48 = arith.truncf %47 : vector<8x8x4xf32> to vector<8x8x4xbf16>
    %49 = vector.extract_strided_slice %12 {offsets = [0, 0], sizes = [8, 4], strides = [1, 1]} : vector<8x32xf32> to vector<8x4xf32>
    %50 = vector.extract_strided_slice %12 {offsets = [0, 4], sizes = [8, 4], strides = [1, 1]} : vector<8x32xf32> to vector<8x4xf32>
    %51 = vector.extract_strided_slice %12 {offsets = [0, 8], sizes = [8, 4], strides = [1, 1]} : vector<8x32xf32> to vector<8x4xf32>
    %52 = vector.extract_strided_slice %12 {offsets = [0, 12], sizes = [8, 4], strides = [1, 1]} : vector<8x32xf32> to vector<8x4xf32>
    %53 = vector.extract_strided_slice %12 {offsets = [0, 16], sizes = [8, 4], strides = [1, 1]} : vector<8x32xf32> to vector<8x4xf32>
    %54 = vector.extract_strided_slice %12 {offsets = [0, 20], sizes = [8, 4], strides = [1, 1]} : vector<8x32xf32> to vector<8x4xf32>
    %55 = vector.extract_strided_slice %12 {offsets = [0, 24], sizes = [8, 4], strides = [1, 1]} : vector<8x32xf32> to vector<8x4xf32>
    %56 = vector.extract_strided_slice %12 {offsets = [0, 28], sizes = [8, 4], strides = [1, 1]} : vector<8x32xf32> to vector<8x4xf32>
    %57 = vector.shape_cast %49 : vector<8x4xf32> to vector<1x8x4xf32>
    %58 = vector.shape_cast %50 : vector<8x4xf32> to vector<1x8x4xf32>
    %59 = vector.shape_cast %51 : vector<8x4xf32> to vector<1x8x4xf32>
    %60 = vector.shape_cast %52 : vector<8x4xf32> to vector<1x8x4xf32>
    %61 = vector.shape_cast %53 : vector<8x4xf32> to vector<1x8x4xf32>
    %62 = vector.shape_cast %54 : vector<8x4xf32> to vector<1x8x4xf32>
    %63 = vector.shape_cast %55 : vector<8x4xf32> to vector<1x8x4xf32>
    %64 = vector.shape_cast %56 : vector<8x4xf32> to vector<1x8x4xf32>
    %65 = tpu.concatenate %57, %58, %59, %60, %61, %62, %63, %64 in 0 : vector<1x8x4xf32>, vector<1x8x4xf32>, vector<1x8x4xf32>, vector<1x8x4xf32>, vector<1x8x4xf32>, vector<1x8x4xf32>, vector<1x8x4xf32>, vector<1x8x4xf32> -> vector<8x8x4xf32>
    %66 = arith.truncf %65 : vector<8x8x4xf32> to vector<8x8x4xbf16>
    "tpu.trace_start"() <{level = 10 : i32, message = "hid,hjd->hij"}> : () -> ()
    %cst_7 = arith.constant dense<0.000000e+00> : vector<8x8x8xf32>
    %67 = tpu.matmul %30, %48, %cst_7 {dimension_numbers = #tpu.dot_dimension_numbers<[2], [2], [1], [1], [0, 0, 0, 1, 1, 1], [0], [0]>} : vector<8x8x4xbf16>, vector<8x8x4xbf16>, vector<8x8x8xf32> -> vector<8x8x8xf32>
    "tpu.trace_stop"() : () -> ()
    %cst_8 = arith.constant dense<0xFF800000> : vector<8x8xf32>
    %68 = vector.multi_reduction <maximumf>, %67, %cst_8 [2] : vector<8x8x8xf32> to vector<8x8xf32>
    %69 = vector.shape_cast %68 : vector<8x8xf32> to vector<8x8x1xf32>
    %70 = vector.broadcast %69 : vector<8x8x1xf32> to vector<8x8x8xf32>
    %71 = arith.subf %67, %70 : vector<8x8x8xf32>
    %72 = math.exp %71 : vector<8x8x8xf32>
    %cst_9 = arith.constant dense<0.000000e+00> : vector<8x8xf32>
    %73 = vector.multi_reduction <add>, %72, %cst_9 [2] : vector<8x8x8xf32> to vector<8x8xf32>
    %74 = vector.shape_cast %73 : vector<8x8xf32> to vector<8x8x1xf32>
    %75 = tpu.reciprocal %74 {approx = true} : vector<8x8x1xf32> -> vector<8x8x1xf32>
    %76 = vector.broadcast %75 : vector<8x8x1xf32> to vector<8x8x8xf32>
    %77 = arith.mulf %72, %76 : vector<8x8x8xf32>
    %78 = arith.truncf %77 : vector<8x8x8xf32> to vector<8x8x8xbf16>
    "tpu.trace_start"() <{level = 10 : i32, message = "hij,hjd->hid"}> : () -> ()
    %cst_10 = arith.constant dense<0.000000e+00> : vector<8x8x4xf32>
    %79 = tpu.matmul %78, %66, %cst_10 {dimension_numbers = #tpu.dot_dimension_numbers<[2], [1], [1], [2], [0, 0, 0, 1, 1, 2], [0], [0]>} : vector<8x8x8xbf16>, vector<8x8x4xbf16>, vector<8x8x4xf32> -> vector<8x8x4xf32>
    "tpu.trace_stop"() : () -> ()
    %80 = vector.extract_strided_slice %79 {offsets = [0, 0, 0], sizes = [1, 8, 4], strides = [1, 1, 1]} : vector<8x8x4xf32> to vector<1x8x4xf32>
    %81 = vector.shape_cast %80 : vector<1x8x4xf32> to vector<8x4xf32>
    %82 = vector.extract_strided_slice %79 {offsets = [1, 0, 0], sizes = [1, 8, 4], strides = [1, 1, 1]} : vector<8x8x4xf32> to vector<1x8x4xf32>
    %83 = vector.shape_cast %82 : vector<1x8x4xf32> to vector<8x4xf32>
    %84 = vector.extract_strided_slice %79 {offsets = [2, 0, 0], sizes = [1, 8, 4], strides = [1, 1, 1]} : vector<8x8x4xf32> to vector<1x8x4xf32>
    %85 = vector.shape_cast %84 : vector<1x8x4xf32> to vector<8x4xf32>
    %86 = vector.extract_strided_slice %79 {offsets = [3, 0, 0], sizes = [1, 8, 4], strides = [1, 1, 1]} : vector<8x8x4xf32> to vector<1x8x4xf32>
    %87 = vector.shape_cast %86 : vector<1x8x4xf32> to vector<8x4xf32>
    %88 = vector.extract_strided_slice %79 {offsets = [4, 0, 0], sizes = [1, 8, 4], strides = [1, 1, 1]} : vector<8x8x4xf32> to vector<1x8x4xf32>
    %89 = vector.shape_cast %88 : vector<1x8x4xf32> to vector<8x4xf32>
    %90 = vector.extract_strided_slice %79 {offsets = [5, 0, 0], sizes = [1, 8, 4], strides = [1, 1, 1]} : vector<8x8x4xf32> to vector<1x8x4xf32>
    %91 = vector.shape_cast %90 : vector<1x8x4xf32> to vector<8x4xf32>
    %92 = vector.extract_strided_slice %79 {offsets = [6, 0, 0], sizes = [1, 8, 4], strides = [1, 1, 1]} : vector<8x8x4xf32> to vector<1x8x4xf32>
    %93 = vector.shape_cast %92 : vector<1x8x4xf32> to vector<8x4xf32>
    %94 = vector.extract_strided_slice %79 {offsets = [7, 0, 0], sizes = [1, 8, 4], strides = [1, 1, 1]} : vector<8x8x4xf32> to vector<1x8x4xf32>
    %95 = vector.shape_cast %94 : vector<1x8x4xf32> to vector<8x4xf32>
    %96 = tpu.concatenate %81, %83, %85, %87, %89, %91, %93, %95 in 1 : vector<8x4xf32>, vector<8x4xf32>, vector<8x4xf32>, vector<8x4xf32>, vector<8x4xf32>, vector<8x4xf32>, vector<8x4xf32>, vector<8x4xf32> -> vector<8x32xf32>
    %97 = arith.truncf %96 : vector<8x32xf32> to vector<8x32xbf16>
    %c0_11 = arith.constant 0 : index
    %c0_12 = arith.constant 0 : index
    %98 = vector.load %arg4[%c0_11, %c0_12] : memref<32x32xbf16, #tpu.memory_space<vmem>>, vector<32x32xbf16>
    %cst_13 = arith.constant dense<0.000000e+00> : vector<8x32xf32>
    %99 = tpu.matmul %97, %98, %cst_13 {dimension_numbers = #tpu.dot_dimension_numbers<[1], [0], [0], [1], [0, 0, 1, 1], [], []>} : vector<8x32xbf16>, vector<32x32xbf16>, vector<8x32xf32> -> vector<8x32xf32>
    %c0_14 = arith.constant 0 : index
    %c0_15 = arith.constant 0 : index
    %100 = vector.load %arg5[%c0_14, %c0_15] : memref<1x32xf32, #tpu.memory_space<vmem>>, vector<1x32xf32>
    %101 = vector.broadcast %100 : vector<1x32xf32> to vector<8x32xf32>
    %102 = arith.addf %99, %101 : vector<8x32xf32>
    %c0_16 = arith.constant 0 : index
    %c0_17 = arith.constant 0 : index
    %c0_18 = arith.constant 0 : index
    %103 = vector.load %arg6[%c0_16, %c0_17, %c0_18] : memref<1x8x32xf32, #tpu.memory_space<vmem>>, vector<1x8x32xf32>
    %104 = vector.shape_cast %103 : vector<1x8x32xf32> to vector<8x32xf32>
    %105 = vector.shape_cast %102 : vector<8x32xf32> to vector<1x8x32xf32>
    tpu.vector_store %arg6[%c0_16, %c0_17, %c0_18], %105 {strides = array<i32>} : memref<1x8x32xf32, #tpu.memory_space<vmem>>, vector<1x8x32xf32>,
    return
  }
  func.func @transform_0(%arg0: i32) -> (i32, i32, i32) {
    %c0_i32 = arith.constant 0 : i32
    %c0_i32_0 = arith.constant 0 : i32
    %c0_i32_1 = arith.constant 0 : i32
    return %arg0, %c0_i32, %c0_i32_0 : i32, i32, i32
  }
  func.func @transform_1(%arg0: i32) -> (i32, i32) {
    %c0_i32 = arith.constant 0 : i32
    %c0_i32_0 = arith.constant 0 : i32
    %c0_i32_1 = arith.constant 0 : i32
    return %c0_i32, %c0_i32_0 : i32, i32
  }
  func.func @transform_2(%arg0: i32) -> (i32, i32) {
    %c0_i32 = arith.constant 0 : i32
    %c0_i32_0 = arith.constant 0 : i32
    %c0_i32_1 = arith.constant 0 : i32
    return %c0_i32, %c0_i32_0 : i32, i32
  }
  func.func @transform_3(%arg0: i32) -> (i32, i32) {
    %c0_i32 = arith.constant 0 : i32
    %c0_i32_0 = arith.constant 0 : i32
    %c0_i32_1 = arith.constant 0 : i32
    return %c0_i32, %c0_i32_0 : i32, i32
  }
  func.func @transform_4(%arg0: i32) -> (i32, i32) {
    %c0_i32 = arith.constant 0 : i32
    %c0_i32_0 = arith.constant 0 : i32
    %c0_i32_1 = arith.constant 0 : i32
    return %c0_i32, %c0_i32_0 : i32, i32
  }
  func.func @transform_5(%arg0: i32) -> (i32, i32, i32) {
    %c0_i32 = arith.constant 0 : i32
    %c0_i32_0 = arith.constant 0 : i32
    %c0_i32_1 = arith.constant 0 : i32
    return %arg0, %c0_i32, %c0_i32_0 : i32, i32, i32
  }
}

</mosaic_0001>

<bundles_post_ra>
// kernel: tpu_custom_call.1
= control target key start
LH: loop header
LB: loop body
LE: loop exit
PB: predicated region body
PF: predicated region fallthrough
CT: control target
= control target key end

     0   :  { %10 = vsyncpa [#allocation3], 0  ;;  %s1684_s0 = inlined_call_operand.hbm [shape: f32[2,8,32], index: 0, kind: input, shape index: {}]   ;;  %s1685_s1 = inlined_call_operand.hbm [shape: bf16[32,96], index: 1, kind: input, shape index: {}]   ;;  %s1686_s2 = inlined_call_operand.vmem [shape: f32[1,96], index: 2, kind: input, shape index: {}]   ;;  %s1687_s3 = inlined_call_operand.hbm [shape: bf16[32,32], index: 3, kind: input, shape index: {}]   ;;  %s1688_s4 = inlined_call_operand.vmem [shape: f32[1,32], index: 4, kind: input, shape index: {}]   ;;  %s1689_s5 = inlined_call_operand.hbm [shape: f32[2,8,32], index: 5, kind: output, shape index: {}]  }
   0x1   :  { %12 = vsyncpa [#allocation3 + $0x1], 0 }
   0x2   :  { %13 = vsyncpa [#allocation6], 0 }
   0x3   :  { %14 = vsyncpa [#allocation4], 0 }
   0x4   :  { %16 = vsyncpa [#allocation4 + $0x1], 0  ;;  %s1403_s18 = smov 0   ;;  %s1405_s19 = smov 0  }
   0x5   :  { %s1407_s20 = smov 0   ;;  %s1409_s21 = smov 0  }
   0x6 LB: > { %s174_s24 = sshll.u32 %s1685_s1, 4  ;;  %s1427_s25 = sadd.s32 4294967295, %s1351_s21   ;;  %s1351_s21 = sphi %s1409_s21, %s1700_s21   ;;  %s1347_s20 = sphi %s1407_s20, %s1699_s20   ;;  %s1343_s19 = sphi %s1405_s19, %s1698_s19   ;;  %s1339_s18 = sphi %s1403_s18, %s1697_s18   ;;  %s175_s24 = int_to_ptr.hbm [resolvable:$true] %s174_s24 }
   0x7   : > { %p1019_p0 = scmp.ge.s32.totalorder %s1351_s21, 1  ;;  %p43_p1 = scmp.eq.s32.totalorder %s1427_s25, 0 }
   0x8   : > { %p163_p2 = scmp.lt.s32.totalorder %s1351_s21, 3  ;;  %s1353_s27 = smov [#allocation5]  }
   0x9   : > { %s176_s28 = sshll.u32 %s1353_s27, 4  ;;  %s191_s6 = sshll.u32 %s1687_s3, 4  ;;  %s177_s28 = int_to_ptr.vmem [resolvable:$true] %s176_s28  ;;  %s192_s6 = int_to_ptr.hbm [resolvable:$true] %s191_s6 }
   0xa   : > { %p1432_p3 = pnand %p1019_p0, %p163_p2  ;;  %s1354_s7 = smov [#allocation7]  }
   0xb   : > { %s193_s8 = sshll.u32 %s1354_s7, 4  ;;  %s1355_s9 = smov 64   ;;  %s194_s8 = int_to_ptr.vmem [resolvable:$true] %s193_s8 }
   0xc   : > { %p1084_p4 = pneg %p1432_p3  ;;  %s1356_s10 = smov 4  }
   0xd   : > { %s1018_s11 = sadd.s32 4294967294, %s1351_s21   ;;  %s1446_s12 = sadd.s32 1, %s1351_s21  }
   0xe   : > { %p1085_p6 = pnand %p1084_p4, %p43_p1  ;;  %s26_s13 = ssub.s32 %s1351_s21, %s1446_s12 }
   0xf   : > { %s29_s14 = sadd.s32 1, %s1347_s20  ;;  %p27_p7 = scmp.eq.s32.totalorder %s26_s13, 0 }
  0x10   : > { %1087 = dma.hbm_to_vmem [thread:$0]  (!%p1085_p6), %s175_s24, 256, %s177_s28, [#allocation6], %s1355_s9, %s1355_s9, %s1356_s10  }
  0x11   : > { %1090 = dma.hbm_to_vmem [thread:$0]  (!%p1085_p6), %s192_s6, 256, %s194_s8, [#allocation6], %s1355_s9, %s1355_s9, %s1356_s10  }
  0x12   : > { %p36_p8 = scmp.ne.s32.totalorder %s1347_s20, %s1343_s19  ;;  %p37_p9 = scmp.eq.s32.totalorder %s1351_s21, 0 }
  0x13   : > { %p42_p10 = scmp.ne.s32.totalorder %s1343_s19, %s1339_s18  ;;  %p150_p13 = scmp.eq.s32.totalorder %s1427_s25, 1 }
  0x14   : > { %s1457_s15 = scalar_select %p27_p7, %s1347_s20, %s29_s14  }
  0x15   : > { %p1459_p11 = por %p37_p9, %p36_p8  ;;  %p1465_p12 = por %p43_p1, %p42_p10 }
  0x16   : > { %p156_p0 = scmp.eq.s32.totalorder %s1018_s11, 1  ;;  %p1101_p2 = scmp.lt.s32.totalorder %s1351_s21, 2 }
  0x17   : > { %s210_s22 = sand.u32 1, %s1347_s20   ;;  %p1472_p4 = por %p150_p13, %p36_p8 }
  0x18   : > { %p1476_p6 = por %p156_p0, %p42_p10  ;;  %s1023_s27 = sshll.u32 %s210_s22, 3 }
  0x19   : > { %s1024_s28 = sshll.u32 %s1351_s21, 3  ;;  %s214_s7 = scalar_lea.vmem [#allocation2], %s1023_s27 }
  0x1a   : > { %s218_s6 = scalar_lea.hbm %s1684_s0, %s1024_s28  ;;  %s222_s8 = sshll.u32 %s214_s7, 4  ;;  %s223_s8 = int_to_ptr.vmem [resolvable:$true] %s222_s8 }
  0x1b   : > { %s220_s9 = sshll.u32 %s218_s6, 4  ;;  %p1486_p7 = pnand %p1101_p2, %p1459_p11  ;;  %s221_s9 = int_to_ptr.hbm [resolvable:$true] %s220_s9 }
  0x1c   : > { %s211_s11 = scalar_lea.sflag [#allocation3], %s210_s22  ;;  %s1251_s13 = sshra.s32 %s221_s9, 4  ;;  %s1252_s13 = int_to_ptr.hbm [resolvable:$true] %s1251_s13 }
  0x1d   : > { %s1253_s14 = scalar_lea.hbm %s1252_s13, 8  ;;  %p1255_p9 = pneg %p1486_p7 }
  0x1e   : > { %p1254_p8 = scmp.ne.s32.totalorder %s1252_s13, %s1253_s14  ;;  %s1258_s29 = scalar_lea.hbm %s1684_s0, 16 }
  0x1f   : > { %p1259_p11 = scmp.lt.s32.totalorder %s1252_s13, %s1684_s0  ;;  %p1260_p0 = scmp.lt.s32.totalorder %s1258_s29, %s1253_s14 }
  0x20   : > { %p1256_p10 = pnand %p1255_p9, %p1254_p8 }
  0x21   : > { %p1261_p2 = por %p1260_p0, %p1259_p11 }
  0x22   : > { %p1257_p13 = pneg %p1256_p10 }
  0x24   : > { %p1262_p5 = pnand %p1261_p2, %p1257_p13 }
  0x26   : > { %1265 = shalt.err (!%p1262_p5)
}
  0x27   : > { %1094 = dma.hbm_to_vmem [thread:$0]  (!%p1486_p7), %s221_s9, 128, %s223_s8, %s211_s11  }
  0x28   : > { %231 = sbr.rel (%p1432_p3) target bundleno = 1333 (0x535), region = 40  ;;  %s1503_s22 = sand.u32 (!%p1432_p3), 1, %s1343_s19  }
  0x29   : > { %s1026_s6 = sshll.u32 (!%p1432_p3), %s1503_s22, 3  ;;  %s234_s7 = scalar_lea.sflag (!%p1432_p3), [#allocation3], %s1503_s22 }
  0x2a   : > { %s237_s13 = scalar_lea.vmem (!%p1432_p3), [#allocation2], %s1026_s6 }
  0x2d   : > { %1326 = dma.done.wait (%p1465_p12), %s234_s7, 128  }
  0x2e   : > { %1328 = vsyncadd (%p1465_p12), %s234_s7, 4294967168 }
  0x2f   : > { %1330 = dma.done.wait (%p43_p1), [#allocation6], 512  }
  0x30   : > { %1332 = vsyncadd (%p43_p1), [#allocation6], 4294966784  ;;  %v1069_v0 = vld [vmem:[#allocation5 + $0x8] sm:$0xff]  ;;  %v1068_v1 = vld [vmem:[#allocation5] sm:$0xff]  ;;  %vm298_vm0 = vcmask 261120   ;;  %s1357_s17 = smov 104  }
  0x31   : > { %308 = vmatpush.bf16.msra.mxu0 %v1069_v0  ;;  %v276_v2 = vld [vmem:[%s237_s13] sm:$0xff]  ;;  %s1358_s9 = smov 116   ;;  %s1359_s10 = smov 124   ;;  %vm381_vm1 = vcmask 31744   ;;  %vm671_vm2 = vcmask 1043456   ;;  %vm569_vm3 = vcmask 64512  }
  0x32   : > { %v277_v3 = vpack.c.bf16 %v276_v2, %v276_v2  ;;  %v1157_v4 = vld [vmem:[%s1686_s2] ss:$0 sm:$0xff]  ;;  %s1360_s11 = smov 112   ;;  %s1361_s14 = smov 108   ;;  %vm865_vm4 = vcmask 97280   ;;  %vm867_vm5 = vcmask 130048  }
  0x33   : > { %s1362_s27 = smov 120   ;;  %s1363_s28 = smov 100   ;;  %vm869_vm6 = vcmask 162816   ;;  %vm871_vm7 = vcmask 195584   ;;  %vm873_vm8 = vcmask 228352  }
  0x34   : > { %s1364_s29 = smov 96   ;;  %s1365_s30 = smov 64  }
  0x35   : > { %309 = vmatpush.bf16.msra.mxu0 %v1068_v1  ;;  %s1366_s16 = smov 8   ;;  %s1367_s7 = smov 12  }
  0x36   : > { %s1368_s13 = smov 24   ;;  %s1369_s26 = smov 16  }
  0x37   : > { %s1370_s8 = smov 4  }
  0x38   : > { %1038 = vmatmul.msk.bf16.vlgmr.msra.gmra.mxu0 %vm298_vm0, %v277_v3 }
  0xb5   : > { %v311_v5 = vpop.f32.mrf.mxu0 }
  0xb6   : > { %v312_v6 = vadd.f32 %v1157_v4, %v311_v5 }
  0xb8   : > { %362 = vrot.lane.b32.xlu2 %v312_v6, %s1357_s17  ;;  %353 = vrot.lane.b32.xlu1 %v312_v6, %s1358_s9  ;;  %v1526_v8 = vmul.f32 0.17677669, %v312_v6  ;;  %v368_v26 = vpack.c.bf16 %v312_v6, %v312_v6 }
  0xb9   : > { %347 = vrot.lane.b32.xlu0 %v312_v6, %s1359_s10 }
  0xba   : > { %v377_v29 = vunpack.c.l.b16 %v368_v26  ;;  %v338_v46 = vpack.c.bf16 %v1526_v8, %v1526_v8 }
  0xbc   : > { %v1542_v33 = vpack.c.b16 %v377_v29, %v377_v29 }
  0xbd   : > { %v313_v7 = vpop.f32.mrf.mxu0 }
  0xc0   : > { %356 = vrot.lane.b32.xlu2 %v312_v6, %s1360_s11  ;;  %359 = vrot.lane.b32.xlu1 %v312_v6, %s1361_s14 }
  0xc1   : > { %350 = vrot.lane.b32.xlu0 %v312_v6, %s1362_s27 }
  0xc9   : > { %365 = vrot.lane.b32.xlu0 %v312_v6, %s1363_s28 }
  0xd1   : > { %317 = vrot.lane.b32.xlu0 %v1526_v8, %s1359_s10  ;;  %s1065_s10 = sshll.u32 %s1427_s25, 3  ;;  %s914_s25 = scalar_lea.sflag [#allocation4], %s1503_s22 }
 0x112   : > { %v363_v9 = vpop.permute.xlu2 %362 }
 0x113   : > { %v374_v31 = vpack.c.bf16 %v363_v9, %v363_v9 }
 0x115   : > { %v522_v34 = vunpack.c.l.b16 %v374_v31 }
 0x117   : > { %v1550_v36 = vpack.c.b16 %v522_v34, %v522_v34 }
 0x11a   : > { %v357_v19 = vpop.permute.xlu2 %356 }
 0x11b   : > { %v372_v23 = vpack.c.bf16 %v357_v19, %v357_v19 }
 0x11d   : > { %v474_v27 = vunpack.c.l.b16 %v372_v23 }
 0x11f   : > { %v1538_v30 = vpack.c.b16 %v474_v27, %v474_v27 }
 0x12a   : > { %v354_v10 = vpop.permute.xlu1 %353 }
 0x12b   : > { %v371_v11 = vpack.c.bf16 %v354_v10, %v354_v10  ;;  %v348_v12 = vpop.permute.xlu0 %347 }
 0x12c   : > { %v369_v13 = vpack.c.bf16 %v348_v12, %v348_v12 }
 0x12d   : > { %v450_v14 = vunpack.c.l.b16 %v371_v11 }
 0x12e   : > { %v402_v15 = vunpack.c.l.b16 %v369_v13 }
 0x12f   : > { %v1529_v16 = vpack.c.b16 %v450_v14, %v450_v14 }
 0x130   : > { %v403_v17 = vpack.c.b16 %v402_v15, %v402_v15 }
 0x131   : > { %452 = vrot.lane.b32.xlu0 %v1529_v16, %s1364_s29 }
 0x132   : > { %404 = vrot.lane.b32.xlu1 %v403_v17, %s1364_s29  ;;  %v360_v21 = vpop.permute.xlu1 %359 }
 0x133   : > { %v351_v18 = vpop.permute.xlu0 %350  ;;  %v373_v24 = vpack.c.bf16 %v360_v21, %v360_v21 }
 0x134   : > { %v370_v20 = vpack.c.bf16 %v351_v18, %v351_v18 }
 0x135   : > { %v498_v28 = vunpack.c.l.b16 %v373_v24 }
 0x136   : > { %v426_v22 = vunpack.c.l.b16 %v370_v20 }
 0x137   : > { %v1540_v32 = vpack.c.b16 %v498_v28, %v498_v28 }
 0x138   : > { %v427_v25 = vpack.c.b16 %v426_v22, %v426_v22 }
 0x139   : > { %323 = vrot.lane.b32.xlu0 %v1526_v8, %s1358_s9  ;;  %s1372_s9 = smov 28  }
 0x13a   : > { %428 = vrot.lane.b32.xlu2 %v427_v25, %s1364_s29  ;;  %320 = vrot.lane.b32.xlu1 %v1526_v8, %s1362_s27  ;;  %s924_s27 = scalar_lea.hbm %s1689_s5, %s1065_s10 }
 0x13b   : > { %v366_v35 = vpop.permute.xlu0 %365 }
 0x13c   : > { %v375_v37 = vpack.c.bf16 %v366_v35, %v366_v35 }
 0x13e   : > { %v546_v38 = vunpack.c.l.b16 %v375_v37 }
 0x140   : > { %v1558_v39 = vpack.c.b16 %v546_v38, %v546_v38 }
 0x141   : > { %476 = vrot.lane.b32.xlu0 %v1538_v30, %s1364_s29 }
 0x142   : > { %379 = vrot.lane.b32.xlu2 %v1542_v33, %s1364_s29  ;;  %500 = vrot.lane.b32.xlu1 %v1540_v32, %s1364_s29 }
 0x143   : > { %v318_v42 = vpop.permute.xlu0 %317 }
 0x144   : > { %v339_v52 = vpack.c.bf16 %v318_v42, %v318_v42 }
 0x149   : > { %335 = vrot.lane.b32.xlu0 %v1526_v8, %s1363_s28 }
 0x14a   : > { %524 = vrot.lane.b32.xlu2 %v1550_v36, %s1364_s29  ;;  %329 = vrot.lane.b32.xlu1 %v1526_v8, %s1361_s14 }
 0x151   : > { %688 = vrot.lane.b32.xlu0 %v403_v17, %s1365_s30 }
 0x152   : > { %332 = vrot.lane.b32.xlu2 %v1526_v8, %s1357_s17  ;;  %548 = vrot.lane.b32.xlu1 %v1558_v39, %s1364_s29  ;;  %s1371_s17 = smov 20  }
 0x15a   : > { %326 = vrot.lane.b32.xlu2 %v1526_v8, %s1360_s11  ;;  %709 = vrot.lane.b32.xlu1 %v427_v25, %s1365_s30 }
 0x194   : > { %v429_v40 = vpop.permute.xlu2 %428 }
 0x195   : > { %v434_v41 = vsel %vm381_vm1, %v429_v40, 0 }
 0x196   : > { %443 = vmatpush.bf16.xpose.msra.mxu3 %v434_v41 }
 0x19c   : > { %v380_v43 = vpop.permute.xlu2 %379 }
 0x19d   : > { %v386_v44 = vsel %vm381_vm1, %v380_v43, 0 }
 0x19e   : > { %395 = vmatpush.bf16.xpose.msra.mxu1 %v386_v44 }
 0x1a3   : > { %v453_v45 = vpop.permute.xlu0 %452 }
 0x1a4   : > { %v405_v47 = vpop.permute.xlu1 %404  ;;  %v525_v48 = vpop.permute.xlu2 %524  ;;  %v458_v49 = vsel %vm381_vm1, %v453_v45, 0 }
 0x1a5   : > { %1039 = vmatmul.msk.bf16.vlgmr.msra.gmra.mxu1 %vm381_vm1, %v338_v46  ;;  %v410_v50 = vsel %vm381_vm1, %v405_v47, 0  ;;  %467 = vmatpush.bf16.xpose.msrb.mxu0 %v458_v49  ;;  %v530_v51 = vsel %vm381_vm1, %v525_v48, 0 }
 0x1a6   : > { %419 = vmatpush.bf16.xpose.msra.mxu2 %v410_v50  ;;  %539 = vmatpush.bf16.xpose.msrb.mxu3 %v530_v51 }
 0x1ab   : > { %v324_v53 = vpop.permute.xlu0 %323 }
 0x1ac   : > { %v321_v54 = vpop.permute.xlu1 %320  ;;  %v341_v55 = vpack.c.bf16 %v324_v53, %v324_v53  ;;  %v333_v56 = vpop.permute.xlu2 %332 }
 0x1ad   : > { %v340_v57 = vpack.c.bf16 %v321_v54, %v321_v54  ;;  %1040 = vmatmul.msk.bf16.vlgmr.msra.gmra.mxu2 %vm381_vm1, %v339_v52  ;;  %v344_v2 = vpack.c.bf16 %v333_v56, %v333_v56 }
 0x1ae   : > { %1042 = vmatmul.msk.bf16.vlgmr.msrb.gmra.mxu0 %vm381_vm1, %v341_v55 }
 0x1af   : > { %1041 = vmatmul.msk.bf16.vlgmr.msra.gmra.mxu3 %vm381_vm1, %v340_v57 }
 0x1b3   : > { %v477_v58 = vpop.permute.xlu0 %476 }
 0x1b4   : > { %v501_v59 = vpop.permute.xlu1 %500  ;;  %v482_v60 = vsel %vm381_vm1, %v477_v58, 0  ;;  %v327_v62 = vpop.permute.xlu2 %326 }
 0x1b5   : > { %491 = vmatpush.bf16.xpose.msrb.mxu1 %v482_v60  ;;  %v506_v61 = vsel %vm381_vm1, %v501_v59, 0  ;;  %v342_v63 = vpack.c.bf16 %v327_v62, %v327_v62 }
 0x1b6   : > { %515 = vmatpush.bf16.xpose.msrb.mxu2 %v506_v61 }
 0x1bb   : > { %v336_v0 = vpop.permute.xlu0 %335 }
 0x1bc   : > { %v330_v1 = vpop.permute.xlu1 %329  ;;  %1043 = vmatmul.msk.bf16.vlgmr.msrb.gmra.mxu1 %vm381_vm1, %v342_v63  ;;  %v345_v8 = vpack.c.bf16 %v336_v0, %v336_v0 }
 0x1bd   : > { %v343_v3 = vpack.c.bf16 %v330_v1, %v330_v1 }
 0x1bf   : > { %1044 = vmatmul.msk.bf16.vlgmr.msrb.gmra.mxu2 %vm381_vm1, %v343_v3  ;;  %1045 = vmatmul.msk.bf16.vlgmr.msrb.gmra.mxu3 %vm381_vm1, %v344_v2 }
 0x1c3   : > { %v689_v4 = vpop.permute.xlu0 %688 }
 0x1c4   : > { %v549_v5 = vpop.permute.xlu1 %548  ;;  %v694_v6 = vsel %vm671_vm2, %v689_v4, 0 }
 0x1c5   : > { %v554_v7 = vsel %vm381_vm1, %v549_v5, 0  ;;  %703 = vmatpush.bf16.msra.mxu2 %v694_v6 }
 0x1c6   : > { %563 = vmatpush.bf16.xpose.msra.mxu0 %v554_v7 }
 0x1cc   : > { %v710_v9 = vpop.permute.xlu1 %709 }
 0x1cd   : > { %v715_v10 = vsel %vm671_vm2, %v710_v9, 0  ;;  %1046 = vmatmul.msk.bf16.vlgmr.msra.gmra.mxu0 %vm381_vm1, %v345_v8 }
 0x1ce   : > { %724 = vmatpush.bf16.msra.mxu3 %v715_v10 }
 0x222   : > { %v397_v11 = vpop.f32.mrf.mxu1 }
 0x223   : > { %v570_v12 = vsel %vm569_vm3, %v397_v11, -inf }
 0x224   : > { %571 = vmax.xlane.f32.xlu0 %v570_v12 }
 0x22a   : > { %v399_v13 = vpop.f32.mrf.mxu1 }
 0x22b   : > { %v469_v14 = vpop.f32.mrf.mxu0 }
 0x22c   : > { %v579_v15 = vsel %vm569_vm3, %v469_v14, -inf }
 0x22d   : > { %580 = vmax.xlane.f32.xlu2 %v579_v15 }
 0x230   : > { %v421_v17 = vpop.f32.mrf.mxu2 }
 0x231   : > { %v573_v18 = vsel %vm569_vm3, %v421_v17, -inf }
 0x232   : > { %v445_v19 = vpop.f32.mrf.mxu3  ;;  %574 = vmax.xlane.f32.xlu1 %v573_v18 }
 0x233   : > { %v471_v20 = vpop.f32.mrf.mxu0  ;;  %v576_v21 = vsel %vm569_vm3, %v445_v19, -inf }
 0x235   : > { %577 = vmax.xlane.f32.xlu2 %v576_v21 }
 0x238   : > { %v423_v22 = vpop.f32.mrf.mxu2 }
 0x239   : > { %v493_v23 = vpop.f32.mrf.mxu1 }
 0x23a   : > { %v447_v24 = vpop.f32.mrf.mxu3  ;;  %v582_v25 = vsel %vm569_vm3, %v493_v23, -inf }
 0x23b   : > { %583 = vmax.xlane.f32.xlu0 %v582_v25 }
 0x241   : > { %v495_v26 = vpop.f32.mrf.mxu1 }
 0x242   : > { %v1593_v27 = vpop.f32.mrf.mxu2  ;;  %v541_v28 = vpop.f32.mrf.mxu3 }
 0x243   : > { %v588_v37 = vsel %vm569_vm3, %v541_v28, -inf  ;;  %v585_v58 = vsel %vm569_vm3, %v1593_v27, -inf }
 0x24a   : > { %v519_v29 = vpop.f32.mrf.mxu2  ;;  %v543_v31 = vpop.f32.mrf.mxu3 }
 0x24b   : > { %v1595_v34 = vpop.f32.mrf.mxu0 }
 0x24c   : > { %v591_v52 = vsel %vm569_vm3, %v1595_v34, -inf }
 0x24d   : > { %666 = vrot.lane.b32.xlu2 %v1542_v33, %s1365_s30 }
 0x24f   : > { %772 = vrot.lane.b32.xlu0 %v1540_v32, %s1365_s30 }
 0x253   : > { %v567_v35 = vpop.f32.mrf.mxu0 }
 0x276   : > { %589 = vmax.xlane.f32.xlu2 %v588_v37 }
 0x297   : > { %v572_v38 = vpop.xlane.xlu0 %571 }
 0x298   : > { %v594_v40 = vsub.f32 %v397_v11, %v572_v38 }
 0x29a   : > { %v602_v41 = vmul.f32 1.442695, %v594_v40 }
 0x29c   : > { %1159 = vpow2.f32 %v602_v41 }
 0x2a0   : > { %v581_v42 = vpop.xlane.xlu2 %580 }
 0x2a1   : > { %v597_v43 = vsub.f32 %v469_v14, %v581_v42 }
 0x2a2   : > { %v1160_v44 = vpop.eup %1159 }
 0x2a3   : > { %v608_v45 = vmul.f32 1.442695, %v597_v43  ;;  %v618_v46 = vsel %vm569_vm3, %v1160_v44, 0.0 }
 0x2a4   : > { %619 = vadd.xlane.f32.xlu1 %v618_v46 }
 0x2a5   : > { %1161 = vpow2.f32 %v608_v45  ;;  %v575_v33 = vpop.xlane.xlu1 %574 }
 0x2a6   : > { %v595_v47 = vsub.f32 %v421_v17, %v575_v33 }
 0x2a8   : > { %v604_v48 = vmul.f32 1.442695, %v595_v47  ;;  %v578_v32 = vpop.xlane.xlu2 %577 }
 0x2a9   : > { %v596_v49 = vsub.f32 %v445_v19, %v578_v32 }
 0x2aa   : > { %1163 = vpow2.f32 %v604_v48 }
 0x2ab   : > { %v1603_v50 = vpop.eup %1161  ;;  %v606_v51 = vmul.f32 1.442695, %v596_v49 }
 0x2ac   : > { %592 = vmax.xlane.f32.xlu1 %v591_v52  ;;  %v627_v53 = vsel %vm569_vm3, %v1603_v50, 0.0 }
 0x2ad   : > { %1165 = vpow2.f32 %v606_v51  ;;  %628 = vadd.xlane.f32.xlu2 %v627_v53 }
 0x2ae   : > { %v584_v61 = vpop.xlane.xlu0 %583 }
 0x2af   : > { %v598_v0 = vsub.f32 %v493_v23, %v584_v61 }
 0x2b0   : > { %v667_v54 = vpop.permute.xlu2 %666  ;;  %v1164_v55 = vpop.eup %1163 }
 0x2b1   : > { %v673_v56 = vsel %vm671_vm2, %v667_v54, 0  ;;  %v621_v59 = vsel %vm569_vm3, %v1164_v55, 0.0  ;;  %v610_v1 = vmul.f32 1.442695, %v598_v0 }
 0x2b2   : > { %682 = vmatpush.bf16.msra.mxu1 %v673_v56 }
 0x2b3   : > { %v1166_v57 = vpop.eup %1165  ;;  %1167 = vpow2.f32 %v610_v1 }
 0x2b4   : > { %586 = vmax.xlane.f32.xlu1 %v585_v58  ;;  %v624_v60 = vsel %vm569_vm3, %v1166_v57, 0.0 }
 0x2b5   : > { %622 = vadd.xlane.f32.xlu2 %v621_v59  ;;  %625 = vadd.xlane.f32.xlu0 %v624_v60 }
 0x2b9   : > { %v1168_v5 = vpop.eup %1167 }
 0x2ba   : > { %v630_v8 = vsel %vm569_vm3, %v1168_v5, 0.0 }
 0x2c1   : > { %v773_v62 = vpop.permute.xlu0 %772 }
 0x2c2   : > { %v778_v63 = vsel %vm671_vm2, %v773_v62, 0 }
 0x2c3   : > { %787 = vmatpush.bf16.msrb.mxu2 %v778_v63 }
 0x2cd   : > { %730 = vrot.lane.b32.xlu1 %v1529_v16, %s1365_s30 }
 0x2e9   : > { %v590_v2 = vpop.xlane.xlu2 %589 }
 0x2ea   : > { %v600_v3 = vsub.f32 %v541_v28, %v590_v2 }
 0x2ec   : > { %v614_v4 = vmul.f32 1.442695, %v600_v3 }
 0x2ee   : > { %1169 = vpow2.f32 %v614_v4 }
 0x2f4   : > { %v1170_v6 = vpop.eup %1169 }
 0x2f5   : > { %v636_v7 = vsel %vm569_vm3, %v1170_v6, 0.0 }
 0x2f6   : > { %637 = vadd.xlane.f32.xlu2 %v636_v7 }
 0x2f7   : > { %631 = vadd.xlane.f32.xlu1 %v630_v8 }
 0x30e   : > { %793 = vrot.lane.b32.xlu2 %v1550_v36, %s1365_s30 }
 0x310   : > { %751 = vrot.lane.b32.xlu1 %v1538_v30, %s1365_s30 }
 0x317   : > { %v620_v16 = vpop.xlane.xlu1 %619 }
 0x318   : > { %1171 = vrcp.f32 %v620_v16 }
 0x31e   : > { %v1172_v9 = vpop.eup %1171 }
 0x31f   : > { %v650_v10 = vmul.f32 %v1172_v9, %v1160_v44  ;;  %v593_v11 = vpop.xlane.xlu1 %592 }
 0x320   : > { %v601_v12 = vsub.f32 %v1595_v34, %v593_v11  ;;  %v629_v13 = vpop.xlane.xlu2 %628  ;;  %v1070_v11 = vld [vmem:[#allocation7] sm:$0xff] }
 0x321   : > { %v658_v14 = vpack.c.bf16 %v650_v10, %v650_v10  ;;  %v1071_v10 = vld [vmem:[#allocation7 + $0x8] sm:$0xff] }
 0x322   : > { %v616_v15 = vmul.f32 1.442695, %v601_v12 }
 0x323   : > { %1047 = vmatmul.msk.bf16.vlgmr.msra.gmra.mxu1 %vm569_vm3, %v658_v14 }
 0x324   : > { %1173 = vpow2.f32 %v616_v15 }
 0x327   : > { %v587_v17 = vpop.xlane.xlu1 %586 }
 0x328   : > { %v599_v18 = vsub.f32 %v1593_v27, %v587_v17  ;;  %v623_v36 = vpop.xlane.xlu2 %622  ;;  %v626_v19 = vpop.xlane.xlu0 %625 }
 0x329   : > { %1175 = vrcp.f32 %v623_v36 }
 0x32a   : > { %v1174_v30 = vpop.eup %1173  ;;  %v612_v20 = vmul.f32 1.442695, %v599_v18  ;;  %1177 = vrcp.f32 %v626_v19 }
 0x32b   : > { %v639_v21 = vsel %vm569_vm3, %v1174_v30, 0.0 }
 0x32c   : > { %1179 = vpow2.f32 %v612_v20  ;;  %640 = vadd.xlane.f32.xlu0 %v639_v21 }
 0x32d   : > { %1181 = vrcp.f32 %v629_v13 }
 0x32f   : > { %v1176_v22 = vpop.eup %1175 }
 0x330   : > { %v1178_v23 = vpop.eup %1177  ;;  %v651_v24 = vmul.f32 %v1176_v22, %v1164_v55 }
 0x331   : > { %v652_v25 = vmul.f32 %v1178_v23, %v1166_v57 }
 0x332   : > { %v1180_v26 = vpop.eup %1179  ;;  %v659_v28 = vpack.c.bf16 %v651_v24, %v651_v24 }
 0x333   : > { %v660_v29 = vpack.c.bf16 %v652_v25, %v652_v25  ;;  %v633_v31 = vsel %vm569_vm3, %v1180_v26, 0.0  ;;  %v1182_v27 = vpop.eup %1181 }
 0x334   : > { %634 = vadd.xlane.f32.xlu0 %v633_v31  ;;  %1048 = vmatmul.msk.bf16.vlgmr.msra.gmra.mxu2 %vm569_vm3, %v659_v28  ;;  %v653_v34 = vmul.f32 %v1182_v27, %v1603_v50 }
 0x335   : > { %1049 = vmatmul.msk.bf16.vlgmr.msra.gmra.mxu3 %vm569_vm3, %v660_v29 }
 0x336   : > { %v661_v38 = vpack.c.bf16 %v653_v34, %v653_v34 }
 0x33f   : > { %v731_v35 = vpop.permute.xlu1 %730 }
 0x340   : > { %v736_v37 = vsel %vm671_vm2, %v731_v35, 0 }
 0x341   : > { %745 = vmatpush.bf16.msrb.mxu0 %v736_v37 }
 0x344   : > { %1050 = vmatmul.msk.bf16.vlgmr.msrb.gmra.mxu0 %vm569_vm3, %v661_v38 }
 0x348   : > { %814 = vrot.lane.b32.xlu0 %v1558_v39, %s1365_s30  ;;  %s274_s30 = scalar_lea.vmem [#allocation8], %s1026_s6  ;;  %s1301_s6 = scalar_lea.hbm %s1689_s5, 16 }
 0x369   : > { %v638_v40 = vpop.xlane.xlu2 %637 }
 0x36a   : > { %1183 = vrcp.f32 %v638_v40  ;;  %v632_v46 = vpop.xlane.xlu1 %631 }
 0x36b   : > { %1185 = vrcp.f32 %v632_v46 }
 0x370   : > { %v1184_v41 = vpop.eup %1183 }
 0x371   : > { %v656_v42 = vmul.f32 %v1184_v41, %v1170_v6  ;;  %v794_v43 = vpop.permute.xlu2 %793  ;;  %v1186_v33 = vpop.eup %1185 }
 0x372   : > { %v799_v44 = vsel %vm671_vm2, %v794_v43, 0  ;;  %v654_v47 = vmul.f32 %v1186_v33, %v1168_v5 }
 0x373   : > { %v664_v45 = vpack.c.bf16 %v656_v42, %v656_v42  ;;  %808 = vmatpush.bf16.msrb.mxu3 %v799_v44 }
 0x374   : > { %v662_v39 = vpack.c.bf16 %v654_v47, %v654_v47 }
 0x376   : > { %1053 = vmatmul.msk.bf16.vlgmr.msrb.gmra.mxu3 %vm569_vm3, %v664_v45 }
 0x382   : > { %v752_v48 = vpop.permute.xlu1 %751 }
 0x383   : > { %v757_v32 = vsel %vm671_vm2, %v752_v48, 0 }
 0x384   : > { %766 = vmatpush.bf16.msrb.mxu1 %v757_v32 }
 0x387   : > { %1051 = vmatmul.msk.bf16.vlgmr.msrb.gmra.mxu1 %vm569_vm3, %v662_v39 }
 0x388   : > { %905 = vmatpush.bf16.msra.mxu1 %v1071_v10 }
 0x38c   : > { %906 = vmatpush.bf16.msra.mxu1 %v1070_v11 }
 0x39f   : > { %v641_v49 = vpop.xlane.xlu0 %640 }
 0x3a0   : > { %v684_v50 = vpop.f32.mrf.mxu1 }
 0x3a7   : > { %v635_v51 = vpop.xlane.xlu0 %634 }
 0x3a8   : > { %1187 = vrcp.f32 %v635_v51  ;;  %v686_v52 = vpop.f32.mrf.mxu1 }
 0x3a9   : > { %1189 = vrcp.f32 %v641_v49 }
 0x3ae   : > { %v1188_v53 = vpop.eup %1187 }
 0x3af   : > { %v655_v54 = vmul.f32 %v1188_v53, %v1180_v26  ;;  %v1190_v56 = vpop.eup %1189  ;;  %v1158_v26 = vld [vmem:[%s1688_s4] ss:$0 sm:$0xff] }
 0x3b0   : > { %v657_v59 = vmul.f32 %v1190_v56, %v1174_v30 }
 0x3b1   : > { %v663_v55 = vpack.c.bf16 %v655_v54, %v655_v54 }
 0x3b2   : > { %v665_v62 = vpack.c.bf16 %v657_v59, %v657_v59 }
 0x3b3   : > { %1052 = vmatmul.msk.bf16.vlgmr.msrb.gmra.mxu2 %vm569_vm3, %v663_v55 }
 0x3b7   : > { %v705_v57 = vpop.f32.mrf.mxu2 }
 0x3b8   : > { %v726_v58 = vpop.f32.mrf.mxu3 }
 0x3b9   : > { %840 = vrot.lane.b32.xlu0 %v726_v58, %s1366_s16  ;;  %s926_s16 = sshll.u32 %s274_s30, 4  ;;  %s927_s16 = int_to_ptr.vmem [resolvable:$true] %s926_s16 }
 0x3ba   : > { %v815_v60 = vpop.permute.xlu0 %814 }
 0x3bb   : > { %v820_v61 = vsel %vm671_vm2, %v815_v60, 0 }
 0x3bc   : > { %829 = vmatpush.bf16.msra.mxu0 %v820_v61 }
 0x3bf   : > { %1054 = vmatmul.msk.bf16.vlgmr.msra.gmra.mxu0 %vm569_vm3, %v665_v62  ;;  %v707_v63 = vpop.f32.mrf.mxu2 }
 0x3c0   : > { %v728_v0 = vpop.f32.mrf.mxu3 }
 0x3c1   : > { %v747_v1 = vpop.f32.mrf.mxu0 }
 0x3c2   : > { %844 = vrot.lane.b32.xlu1 %v747_v1, %s1367_s7  ;;  %s928_s7 = sshll.u32 %s924_s27, 4  ;;  %s929_s7 = int_to_ptr.hbm [resolvable:$true] %s928_s7 }
 0x3c9   : > { %v749_v2 = vpop.f32.mrf.mxu0 }
 0x3f9   : > { %v810_v3 = vpop.f32.mrf.mxu3 }
 0x3fa   : > { %856 = vrot.lane.b32.xlu1 %v810_v3, %s1368_s13  ;;  %s1295_s13 = sshra.s32 %s929_s7, 4  ;;  %s1296_s13 = int_to_ptr.hbm [resolvable:$true] %s1295_s13 }
 0x3fb   : > { %p1302_p12 = scmp.lt.s32.totalorder %s1296_s13, %s1689_s5 }
 0x401   : > { %v812_v4 = vpop.f32.mrf.mxu3 }
 0x404   : > { %v768_v5 = vpop.f32.mrf.mxu1 }
 0x405   : > { %848 = vrot.lane.b32.xlu2 %v768_v5, %s1369_s26  ;;  %s1297_s26 = scalar_lea.hbm %s1296_s13, 8 }
 0x406   : > { %p1298_p1 = scmp.ne.s32.totalorder %s1296_s13, %s1297_s26  ;;  %p1303_p7 = scmp.lt.s32.totalorder %s1301_s6, %s1297_s26 }
 0x408   : > { %p1299_p3 = pnand %p1298_p1, %p1472_p4  ;;  %p1304_p8 = por %p1303_p7, %p1302_p12 }
 0x40a   : > { %p1300_p5 = pneg %p1299_p3 }
 0x40c   : > { %v770_v6 = vpop.f32.mrf.mxu1  ;;  %p1305_p9 = pnand %p1304_p8, %p1300_p5 }
 0x40d   : > { %836 = vrot.lane.b32.xlu2 %v705_v57, %s1370_s8 }
 0x42b   : > { %v841_v15 = vpop.permute.xlu0 %840 }
 0x434   : > { %v845_v17 = vpop.permute.xlu1 %844 }
 0x436   : > { %v789_v7 = vpop.f32.mrf.mxu2 }
 0x437   : > { %852 = vrot.lane.b32.xlu0 %v789_v7, %s1371_s17 }
 0x43c   : > { %v831_v8 = vpop.f32.mrf.mxu0 }
 0x43d   : > { %860 = vrot.lane.b32.xlu2 %v831_v8, %s1372_s9 }
 0x43e   : > { %v791_v16 = vpop.f32.mrf.mxu2 }
 0x444   : > { %v833_v9 = vpop.f32.mrf.mxu0 }
 0x45f   : > { %v849_v12 = vpop.permute.xlu2 %848 }
 0x467   : > { %v837_v13 = vpop.permute.xlu2 %836 }
 0x468   : > { %v863_v14 = vsel %vm381_vm1, %v684_v50, %v837_v13 }
 0x469   : > { %v864_v18 = vsel %vm569_vm3, %v863_v14, %v841_v15 }
 0x46a   : > { %v866_v36 = vsel %vm865_vm4, %v864_v18, %v845_v17 }
 0x46b   : > { %v868_v30 = vsel %vm867_vm5, %v866_v36, %v849_v12 }
 0x46c   : > { %v857_v20 = vpop.permute.xlu1 %856 }
 0x497   : > { %v861_v22 = vpop.permute.xlu2 %860 }
 0x4a9   : > { %v853_v19 = vpop.permute.xlu0 %852 }
 0x4aa   : > { %v870_v21 = vsel %vm869_vm6, %v868_v30, %v853_v19 }
 0x4ab   : > { %v872_v23 = vsel %vm871_vm7, %v870_v21, %v857_v20 }
 0x4ac   : > { %v874_v24 = vsel %vm873_vm8, %v872_v23, %v861_v22 }
 0x4ad   : > { %v875_v25 = vpack.c.bf16 %v874_v24, %v874_v24 }
 0x4af   : > { %1063 = vmatmul.msk.bf16.vlgmr.msra.gmra.mxu1 %vm298_vm0, %v875_v25 }
 0x52c   : > { %v908_v28 = vpop.f32.mrf.mxu1 }
 0x52d   : > { %v909_v29 = vadd.f32 %v1158_v26, %v908_v28 }
 0x52f   : > { %912 = vst.msk [vmem:[%s274_s30] sm:$0xff] %vm298_vm0, %v909_v29 }
 0x530   : > { %1308 = shalt.err (!%p1305_p9)
}
 0x531   : > { %1082 = dma.vmem_to_hbm [thread:$0]  (%p1472_p4), %s927_s16, 128, %s929_s7, %s914_s25  }
 0x534   : > { %v910_v31 = vpop.f32.mrf.mxu1 }
 0x535 PF: > { %s940_s22 = sand.u32 1, %s1339_s18   ;;  %p1696_p10 = scmp.ge.s32.totalorder %s1351_s21, 2 }
 0x536   : > { %s941_s11 = scalar_lea.sflag [#allocation4], %s940_s22 }
 0x537   : > { %p1096_p13 = pnand %p1696_p10, %p1476_p6 }
 0x539   : > { %p1097_p11 = pneg %p1096_p13 }
 0x53b   : > { %1334 = dma.done.wait (%p1097_p11), %s941_s11, 128  }
 0x53c   : > { %1336 = vsyncadd (%p1097_p11), %s941_s11, 4294967168  ;;  %p19_p0 = scmp.ge.s32.totalorder %s1446_s12, 4   ;;  %s1697_s18 = smov %s1343_s19 }
 0x53d   : > { %s1698_s19 = smov %s1347_s20  ;;  %s1699_s20 = smov %s1457_s15 }
 0x53e   : > { %s1700_s21 = smov %s1446_s12  ;;  %21 = sbr.rel (!%p19_p0) target bundleno = 6 (0x6), region = 93 }
 0x543   :  { %947 = vsyncpa [#allocation3], 1 }
 0x544   :  { %949 = vsyncpa [#allocation3 + $0x1], 1 }
 0x545   :  { %950 = vsyncpa [#allocation6], 1 }
 0x546   :  { %951 = vsyncpa [#allocation4], 1 }
 0x547   :  { %953 = vsyncpa [#allocation4 + $0x1], 1 }

</bundles_post_ra>
